<compile_context>
chip_gen: v7x
topology: tpu7x:2x2x1
jax: 0.10.0
libtpu: 0.0.40
codegen_flags: <defaults>
</compile_context>

<pallas_src>
import jax
import jax.numpy as jnp
import numpy as np
from jax.experimental import pallas as pl
from jax.experimental.pallas import tpu as pltpu


# ----------------------------------------------------------------------------
# Fused Pallas kernel (one image per grid step)
# ----------------------------------------------------------------------------
def _make_double_conv_kernel(H, W, Cin, Cout):
    def kernel(x_ref, wb1_ref, s1_ref, b1_ref, wb2_ref, s2_ref, b2_ref,
               o_ref, xpad_ref, ypad_ref):
        """Fused (conv3x3 -> BN(eval) -> ReLU) x 2 for one batch element.

        x_ref   : (1, H, W*Cin)           bf16 lane-collapsed input tile
        wb*_ref : (3, (W+2)*C, W*Cout)    bf16 banded per-row conv weights
        s*/b*   : (1, W*Cout)             f32 folded (bias+BN) scale / shift
        o_ref   : (1, H, W*Cout)          bf16 lane-dense output tile
        xpad_ref: VMEM (H+2, (W+2)*Cin)   bf16 zero-haloed input
        ypad_ref: VMEM (H+2, (W+2)*Cout)  bf16 zero-haloed intermediate
        """
        # ---- zero only the 1-px halo ring; the interiors are fully
        # overwritten every grid step.  Done each step (cheap, bf16) because
        # the batch axis is "parallel" -> per-core scratch, cannot gate on
        # program_id == 0.
        xz_row = jnp.zeros((1, (W + 2) * Cin), xpad_ref.dtype)
        xpad_ref[0:1, :] = xz_row
        xpad_ref[H + 1:H + 2, :] = xz_row
        xz_col = jnp.zeros((H + 2, Cin), xpad_ref.dtype)
        xpad_ref[:, 0:Cin] = xz_col
        xpad_ref[:, (W + 1) * Cin:(W + 2) * Cin] = xz_col

        yz_row = jnp.zeros((1, (W + 2) * Cout), ypad_ref.dtype)
        ypad_ref[0:1, :] = yz_row
        ypad_ref[H + 1:H + 2, :] = yz_row
        yz_col = jnp.zeros((H + 2, Cout), ypad_ref.dtype)
        ypad_ref[:, 0:Cout] = yz_col
        ypad_ref[:, (W + 1) * Cout:(W + 2) * Cout] = yz_col

        # ---- lane-dense halo fill: contiguous 2-D copy, no reshape needed.
        xpad_ref[1:H + 1, Cin:(W + 1) * Cin] = x_ref[0]

        def conv_bn_relu(src_ref, wb_ref, s_ref, b_ref):
            # 3x3 SAME conv as 3 bf16 MXU matmuls with f32 accumulation,
            # followed by f32 folded-BN + ReLU epilogue.
            acc = jnp.dot(src_ref[0:H, :], wb_ref[0],
                          preferred_element_type=jnp.float32)
            for ky in range(1, 3):
                acc = acc + jnp.dot(src_ref[ky:ky + H, :], wb_ref[ky],
                                    preferred_element_type=jnp.float32)
            return jnp.maximum(acc * s_ref[...] + b_ref[...], 0.0)

        # conv1 -> intermediate stays resident in VMEM (bf16, no HBM trip).
        y1 = conv_bn_relu(xpad_ref, wb1_ref, s1_ref, b1_ref)
        ypad_ref[1:H + 1, Cout:(W + 1) * Cout] = y1.astype(ypad_ref.dtype)

        # conv2 -> single lane-dense (H, W*Cout) bf16 store.
        y2 = conv_bn_relu(ypad_ref, wb2_ref, s2_ref, b2_ref)
        o_ref[0] = y2.astype(o_ref.dtype)

    return kernel


# ----------------------------------------------------------------------------
# Wrapper
# ----------------------------------------------------------------------------
def double_conv_lane_collapsed(x2d, H, W, Cin, Cout, wb1, s1, b1, wb2, s2, b2):
    N = x2d.shape[0]
    kernel = _make_double_conv_kernel(H, W, Cin, Cout)
    grid_spec = pltpu.PrefetchScalarGridSpec(
        num_scalar_prefetch=0,
        grid=(N,),
        in_specs=[
            pl.BlockSpec((1, H, W * Cin), lambda n: (n, 0, 0)),
            pl.BlockSpec((3, (W + 2) * Cin, W * Cout), lambda n: (0, 0, 0)),
            pl.BlockSpec((1, W * Cout), lambda n: (0, 0)),
            pl.BlockSpec((1, W * Cout), lambda n: (0, 0)),
            pl.BlockSpec((3, (W + 2) * Cout, W * Cout), lambda n: (0, 0, 0)),
            pl.BlockSpec((1, W * Cout), lambda n: (0, 0)),
            pl.BlockSpec((1, W * Cout), lambda n: (0, 0)),
        ],
        out_specs=pl.BlockSpec((1, H, W * Cout), lambda n: (n, 0, 0)),
        scratch_shapes=[
            pltpu.VMEM((H + 2, (W + 2) * Cin), jnp.bfloat16),
            pltpu.VMEM((H + 2, (W + 2) * Cout), jnp.bfloat16),
        ],
    )
    return pl.pallas_call(
        kernel,
        out_shape=jax.ShapeDtypeStruct((N, H, W * Cout), jnp.bfloat16),
        grid_spec=grid_spec,
        # VMEM use is tiny here; leave vmem_limit_bytes at the default rather
        # than pinning it to the full per-core capacity (review: v7x headroom).
        compiler_params=pltpu.CompilerParams(
            dimension_semantics=("parallel",),
        ),
    )(x2d, wb1, s1, b1, wb2, s2, b2)


# ----------------------------------------------------------------------------
# Parameter construction (deterministic, synthetic) + BN folding + banding
# ----------------------------------------------------------------------------
def _fold_bn(conv_b, gamma, beta, mean, var, eps=1e-5):
    scale = gamma / jnp.sqrt(var + eps)
    shift = (conv_b - mean) * scale + beta
    return scale.astype(jnp.float32), shift.astype(jnp.float32)


def _tile_per_channel(v, W):
    # per-channel (C,) -> lane-collapsed (1, W*C), column index = w*C + c.
    return jnp.tile(v, (W,)).reshape(1, -1).astype(jnp.float32)


def _make_banded_weights(w_oihw, W):
    """(Cout, Cin, 3, 3) f32 -> (3, (W+2)*Cin, W*Cout) bf16 banded matrices.

    B[ky][(w+kx)*Cin + ci, w*Cout + co] = w_oihw[co, ci, ky, kx], so that
    y[h, w*Cout + co] = sum_ky (xpad_row[h+ky] @ B[ky])[w*Cout + co]
    reproduces a SAME 3x3 convolution on lane-collapsed padded rows.
    """
    w = np.asarray(w_oihw, np.float32)
    Cout, Cin = w.shape[0], w.shape[1]
    B = np.zeros((3, (W + 2) * Cin, W * Cout), np.float32)
    for ky in range(3):
        for kx in range(3):
            blk = w[:, :, ky, kx].T                     # (Cin, Cout)
            for col in range(W):
                r0 = (col + kx) * Cin
                c0 = col * Cout
                B[ky, r0:r0 + Cin, c0:c0 + Cout] = blk
    return jnp.asarray(B).astype(jnp.bfloat16)


def make_double_conv_params(key, in_ch, out_ch, W):
    ks = jax.random.split(key, 10)
    w1 = 0.1 * jax.random.normal(ks[0], (out_ch, in_ch, 3, 3), jnp.float32)
    b1 = 0.1 * jax.random.normal(ks[1], (out_ch,), jnp.float32)
    g1 = 1.0 + 0.1 * jax.random.normal(ks[2], (out_ch,), jnp.float32)
    be1 = 0.1 * jax.random.normal(ks[3], (out_ch,), jnp.float32)
    m1 = 0.05 * jax.random.normal(ks[4], (out_ch,), jnp.float32)
    v1 = 1.0 + 0.1 * jnp.abs(jax.random.normal(ks[5], (out_ch,), jnp.float32))

    w2 = 0.1 * jax.random.normal(ks[6], (out_ch, out_ch, 3, 3), jnp.float32)
    b2 = 0.1 * jax.random.normal(ks[7], (out_ch,), jnp.float32)
    g2 = 1.0 + 0.1 * jax.random.normal(ks[8], (out_ch,), jnp.float32)
    be2 = 0.1 * jax.random.normal(ks[9], (out_ch,), jnp.float32)
    m2 = jnp.zeros((out_ch,), jnp.float32)
    v2 = jnp.ones((out_ch,), jnp.float32)

    s1, sh1 = _fold_bn(b1, g1, be1, m1, v1)
    s2, sh2 = _fold_bn(b2, g2, be2, m2, v2)

    params = dict(
        wb1=_make_banded_weights(w1, W),                # bf16 MXU inputs
        wb2=_make_banded_weights(w2, W),
        scale1=_tile_per_channel(s1, W), shift1=_tile_per_channel(sh1, W),
        scale2=_tile_per_channel(s2, W), shift2=_tile_per_channel(sh2, W),
    )
    ref = dict(w1=w1, w2=w2, scale1=s1, shift1=sh1, scale2=s2, shift2=sh2)
    return params, ref


# ----------------------------------------------------------------------------
# DoubleConv.forward
# ----------------------------------------------------------------------------
@jax.jit
def double_conv_forward(x_nchw, params):
    N, Cin, H, W = x_nchw.shape
    Cout = params["scale1"].shape[1] // W
    # NCHW (PyTorch) -> lane-collapsed NHWC (N, H, W*Cin) bf16 (free reshape).
    # In a full network these boundary transposes disappear by staying NHWC
    # / bf16 end-to-end across adjacent blocks.
    x = jnp.transpose(x_nchw, (0, 2, 3, 1)).astype(jnp.bfloat16)
    x = x.reshape(N, H, W * Cin)
    y = double_conv_lane_collapsed(
        x, H, W, Cin, Cout,
        params["wb1"], params["scale1"], params["shift1"],
        params["wb2"], params["scale2"], params["shift2"])
    y = y.reshape(N, H, W, Cout)
    return jnp.transpose(y, (0, 3, 1, 2))               # NCHW, bf16


# ----------------------------------------------------------------------------
# Pure-JAX reference (mirrors the kernel's bf16 quantization points)
# ----------------------------------------------------------------------------
def _reference_double_conv(x_nchw, ref):
    x = jnp.transpose(x_nchw, (0, 2, 3, 1))
    x = x.astype(jnp.bfloat16).astype(jnp.float32)

    def conv(x_nhwc, w_oihw, scale, shift):
        w = jnp.transpose(w_oihw, (2, 3, 1, 0))          # HWIO
        w = w.astype(jnp.bfloat16).astype(jnp.float32)
        y = jax.lax.conv_general_dilated(
            x_nhwc, w, window_strides=(1, 1), padding="SAME",
            dimension_numbers=("NHWC", "HWIO", "NHWC"))
        return jnp.maximum(y * scale + shift, 0.0)

    y1 = conv(x, ref["w1"], ref["scale1"], ref["shift1"])
    y1 = y1.astype(jnp.bfloat16).astype(jnp.float32)     # kernel feeds conv2 bf16
    y2 = conv(y1, ref["w2"], ref["scale2"], ref["shift2"])
    y2 = y2.astype(jnp.bfloat16).astype(jnp.float32)     # kernel emits bf16
    return jnp.transpose(y2, (0, 3, 1, 2))


# ----------------------------------------------------------------------------
if __name__ == "__main__":
    key = jax.random.PRNGKey(0)
    k_x, k_p = jax.random.split(key, 2)

    N, in_ch, out_ch, H, W = 2, 4, 8, 16, 16
    x = jax.random.normal(k_x, (N, in_ch, H, W), jnp.float32)
    params, ref = make_double_conv_params(k_p, in_ch, out_ch, W)

    out = double_conv_forward(x, params)
    jax.block_until_ready(out)
    assert out.shape == (N, out_ch, H, W), out.shape

    expected = _reference_double_conv(x, ref)
    err = float(jnp.max(jnp.abs(out.astype(jnp.float32) - expected)))
    assert err < 2e-2, f"max abs error vs reference: {err}"
    print("KERNEL_OK")
</pallas_src>

<mosaic_0001>
module attributes {stable_mosaic.version = 11 : i64} {
  func.func @kernel(%arg0: i32, %arg1: memref<1x16x64xbf16, #tpu.memory_space<vmem>>, %arg2: memref<3x72x128xbf16, #tpu.memory_space<vmem>>, %arg3: memref<1x128xf32, #tpu.memory_space<vmem>>, %arg4: memref<1x128xf32, #tpu.memory_space<vmem>>, %arg5: memref<3x144x128xbf16, #tpu.memory_space<vmem>>, %arg6: memref<1x128xf32, #tpu.memory_space<vmem>>, %arg7: memref<1x128xf32, #tpu.memory_space<vmem>>, %arg8: memref<1x16x128xbf16, #tpu.memory_space<vmem>>, %arg9: memref<18x72xbf16, #tpu.memory_space<vmem>>, %arg10: memref<18x144xbf16, #tpu.memory_space<vmem>>) attributes {dimension_semantics = [#tpu.dimension_semantics<parallel>], iteration_bounds = array<i64: 2>, scalar_prefetch = 0 : i64, scratch_operands = 2 : i64, tpu.core_type = #tpu.core_type<tc>, window_params = [{transform_indices = @transform_0, window_bounds = array<i64: 1, 16, 64>}, {pipeline_mode = #tpu.pipeline_mode<synchronous>, transform_indices = @transform_1, window_bounds = array<i64: 3, 72, 128>}, {pipeline_mode = #tpu.pipeline_mode<synchronous>, transform_indices = @transform_2, window_bounds = array<i64: 1, 128>}, {pipeline_mode = #tpu.pipeline_mode<synchronous>, transform_indices = @transform_3, window_bounds = array<i64: 1, 128>}, {pipeline_mode = #tpu.pipeline_mode<synchronous>, transform_indices = @transform_4, window_bounds = array<i64: 3, 144, 128>}, {pipeline_mode = #tpu.pipeline_mode<synchronous>, transform_indices = @transform_5, window_bounds = array<i64: 1, 128>}, {pipeline_mode = #tpu.pipeline_mode<synchronous>, transform_indices = @transform_6, window_bounds = array<i64: 1, 128>}, {transform_indices = @transform_7, window_bounds = array<i64: 1, 16, 128>}]} {
    %cst = arith.constant 0.000000e+00 : bf16
    %0 = vector.broadcast %cst : bf16 to vector<1x72xbf16>
    %c0 = arith.constant 0 : index
    %c0_0 = arith.constant 0 : index
    %1 = vector.load %arg9[%c0, %c0_0] : memref<18x72xbf16, #tpu.memory_space<vmem>>, vector<1x72xbf16>
    tpu.vector_store %arg9[%c0, %c0_0], %0 {strides = array<i32>} : memref<18x72xbf16, #tpu.memory_space<vmem>>, vector<1x72xbf16>,
    %c17 = arith.constant 17 : index
    %c0_1 = arith.constant 0 : index
    %2 = vector.load %arg9[%c17, %c0_1] : memref<18x72xbf16, #tpu.memory_space<vmem>>, vector<1x72xbf16>
    tpu.vector_store %arg9[%c17, %c0_1], %0 {strides = array<i32>} : memref<18x72xbf16, #tpu.memory_space<vmem>>, vector<1x72xbf16>,
    %cst_2 = arith.constant 0.000000e+00 : bf16
    %3 = vector.broadcast %cst_2 : bf16 to vector<18x4xbf16>
    %c0_3 = arith.constant 0 : index
    %c0_4 = arith.constant 0 : index
    %4 = vector.load %arg9[%c0_3, %c0_4] : memref<18x72xbf16, #tpu.memory_space<vmem>>, vector<18x4xbf16>
    tpu.vector_store %arg9[%c0_3, %c0_4], %3 {strides = array<i32>} : memref<18x72xbf16, #tpu.memory_space<vmem>>, vector<18x4xbf16>,
    %c0_5 = arith.constant 0 : index
    %c68 = arith.constant 68 : index
    %5 = vector.load %arg9[%c0_5, %c68] : memref<18x72xbf16, #tpu.memory_space<vmem>>, vector<18x4xbf16>
    tpu.vector_store %arg9[%c0_5, %c68], %3 {strides = array<i32>} : memref<18x72xbf16, #tpu.memory_space<vmem>>, vector<18x4xbf16>,
    %cst_6 = arith.constant 0.000000e+00 : bf16
    %6 = vector.broadcast %cst_6 : bf16 to vector<1x144xbf16>
    %c0_7 = arith.constant 0 : index
    %c0_8 = arith.constant 0 : index
    %7 = vector.load %arg10[%c0_7, %c0_8] : memref<18x144xbf16, #tpu.memory_space<vmem>>, vector<1x144xbf16>
    tpu.vector_store %arg10[%c0_7, %c0_8], %6 {strides = array<i32>} : memref<18x144xbf16, #tpu.memory_space<vmem>>, vector<1x144xbf16>,
    %c17_9 = arith.constant 17 : index
    %c0_10 = arith.constant 0 : index
    %8 = vector.load %arg10[%c17_9, %c0_10] : memref<18x144xbf16, #tpu.memory_space<vmem>>, vector<1x144xbf16>
    tpu.vector_store %arg10[%c17_9, %c0_10], %6 {strides = array<i32>} : memref<18x144xbf16, #tpu.memory_space<vmem>>, vector<1x144xbf16>,
    %cst_11 = arith.constant 0.000000e+00 : bf16
    %9 = vector.broadcast %cst_11 : bf16 to vector<18x8xbf16>
    %c0_12 = arith.constant 0 : index
    %c0_13 = arith.constant 0 : index
    %10 = vector.load %arg10[%c0_12, %c0_13] : memref<18x144xbf16, #tpu.memory_space<vmem>>, vector<18x8xbf16>
    tpu.vector_store %arg10[%c0_12, %c0_13], %9 {strides = array<i32>} : memref<18x144xbf16, #tpu.memory_space<vmem>>, vector<18x8xbf16>,
    %c0_14 = arith.constant 0 : index
    %c136 = arith.constant 136 : index
    %11 = vector.load %arg10[%c0_14, %c136] : memref<18x144xbf16, #tpu.memory_space<vmem>>, vector<18x8xbf16>
    tpu.vector_store %arg10[%c0_14, %c136], %9 {strides = array<i32>} : memref<18x144xbf16, #tpu.memory_space<vmem>>, vector<18x8xbf16>,
    %c0_15 = arith.constant 0 : index
    %c0_16 = arith.constant 0 : index
    %c0_17 = arith.constant 0 : index
    %12 = vector.load %arg1[%c0_15, %c0_16, %c0_17] : memref<1x16x64xbf16, #tpu.memory_space<vmem>>, vector<1x16x64xbf16>
    %13 = vector.shape_cast %12 : vector<1x16x64xbf16> to vector<16x64xbf16>
    %c1 = arith.constant 1 : index
    %c4 = arith.constant 4 : index
    %14 = vector.load %arg9[%c1, %c4] : memref<18x72xbf16, #tpu.memory_space<vmem>>, vector<16x64xbf16>
    tpu.vector_store %arg9[%c1, %c4], %13 {strides = array<i32>} : memref<18x72xbf16, #tpu.memory_space<vmem>>, vector<16x64xbf16>,
    %c0_18 = arith.constant 0 : index
    %c0_19 = arith.constant 0 : index
    %15 = vector.load %arg9[%c0_18, %c0_19] : memref<18x72xbf16, #tpu.memory_space<vmem>>, vector<16x72xbf16>
    %c0_20 = arith.constant 0 : index
    %c0_21 = arith.constant 0 : index
    %c0_22 = arith.constant 0 : index
    %16 = vector.load %arg2[%c0_20, %c0_21, %c0_22] : memref<3x72x128xbf16, #tpu.memory_space<vmem>>, vector<1x72x128xbf16>
    %17 = vector.shape_cast %16 : vector<1x72x128xbf16> to vector<72x128xbf16>
    %cst_23 = arith.constant dense<0.000000e+00> : vector<16x128xf32>
    %18 = tpu.matmul %15, %17, %cst_23 {dimension_numbers = #tpu.dot_dimension_numbers<[1], [0], [0], [1], [0, 0, 1, 1], [], []>} : vector<16x72xbf16>, vector<72x128xbf16>, vector<16x128xf32> -> vector<16x128xf32>
    %c1_24 = arith.constant 1 : index
    %c0_25 = arith.constant 0 : index
    %19 = vector.load %arg9[%c1_24, %c0_25] : memref<18x72xbf16, #tpu.memory_space<vmem>>, vector<16x72xbf16>
    %c1_26 = arith.constant 1 : index
    %c0_27 = arith.constant 0 : index
    %c0_28 = arith.constant 0 : index
    %20 = vector.load %arg2[%c1_26, %c0_27, %c0_28] : memref<3x72x128xbf16, #tpu.memory_space<vmem>>, vector<1x72x128xbf16>
    %21 = vector.shape_cast %20 : vector<1x72x128xbf16> to vector<72x128xbf16>
    %cst_29 = arith.constant dense<0.000000e+00> : vector<16x128xf32>
    %22 = tpu.matmul %19, %21, %cst_29 {dimension_numbers = #tpu.dot_dimension_numbers<[1], [0], [0], [1], [0, 0, 1, 1], [], []>} : vector<16x72xbf16>, vector<72x128xbf16>, vector<16x128xf32> -> vector<16x128xf32>
    %23 = arith.addf %18, %22 : vector<16x128xf32>
    %c2 = arith.constant 2 : index
    %c0_30 = arith.constant 0 : index
    %24 = vector.load %arg9[%c2, %c0_30] : memref<18x72xbf16, #tpu.memory_space<vmem>>, vector<16x72xbf16>
    %c2_31 = arith.constant 2 : index
    %c0_32 = arith.constant 0 : index
    %c0_33 = arith.constant 0 : index
    %25 = vector.load %arg2[%c2_31, %c0_32, %c0_33] : memref<3x72x128xbf16, #tpu.memory_space<vmem>>, vector<1x72x128xbf16>
    %26 = vector.shape_cast %25 : vector<1x72x128xbf16> to vector<72x128xbf16>
    %cst_34 = arith.constant dense<0.000000e+00> : vector<16x128xf32>
    %27 = tpu.matmul %24, %26, %cst_34 {dimension_numbers = #tpu.dot_dimension_numbers<[1], [0], [0], [1], [0, 0, 1, 1], [], []>} : vector<16x72xbf16>, vector<72x128xbf16>, vector<16x128xf32> -> vector<16x128xf32>
    %28 = arith.addf %23, %27 : vector<16x128xf32>
    %c0_35 = arith.constant 0 : index
    %c0_36 = arith.constant 0 : index
    %29 = vector.load %arg3[%c0_35, %c0_36] : memref<1x128xf32, #tpu.memory_space<vmem>>, vector<1x128xf32>
    %30 = vector.broadcast %29 : vector<1x128xf32> to vector<16x128xf32>
    %31 = arith.mulf %28, %30 : vector<16x128xf32>
    %c0_37 = arith.constant 0 : index
    %c0_38 = arith.constant 0 : index
    %32 = vector.load %arg4[%c0_37, %c0_38] : memref<1x128xf32, #tpu.memory_space<vmem>>, vector<1x128xf32>
    %33 = vector.broadcast %32 : vector<1x128xf32> to vector<16x128xf32>
    %34 = arith.addf %31, %33 : vector<16x128xf32>
    %cst_39 = arith.constant 0.000000e+00 : f32
    %35 = vector.broadcast %cst_39 : f32 to vector<16x128xf32>
    %36 = arith.maximumf %34, %35 : vector<16x128xf32>
    %37 = arith.truncf %36 : vector<16x128xf32> to vector<16x128xbf16>
    %c1_40 = arith.constant 1 : index
    %c8 = arith.constant 8 : index
    %38 = vector.load %arg10[%c1_40, %c8] : memref<18x144xbf16, #tpu.memory_space<vmem>>, vector<16x128xbf16>
    tpu.vector_store %arg10[%c1_40, %c8], %37 {strides = array<i32>} : memref<18x144xbf16, #tpu.memory_space<vmem>>, vector<16x128xbf16>,
    %c0_41 = arith.constant 0 : index
    %c0_42 = arith.constant 0 : index
    %39 = vector.load %arg10[%c0_41, %c0_42] : memref<18x144xbf16, #tpu.memory_space<vmem>>, vector<16x144xbf16>
    %c0_43 = arith.constant 0 : index
    %c0_44 = arith.constant 0 : index
    %c0_45 = arith.constant 0 : index
    %40 = vector.load %arg5[%c0_43, %c0_44, %c0_45] : memref<3x144x128xbf16, #tpu.memory_space<vmem>>, vector<1x144x128xbf16>
    %41 = vector.shape_cast %40 : vector<1x144x128xbf16> to vector<144x128xbf16>
    %cst_46 = arith.constant dense<0.000000e+00> : vector<16x128xf32>
    %42 = tpu.matmul %39, %41, %cst_46 {dimension_numbers = #tpu.dot_dimension_numbers<[1], [0], [0], [1], [0, 0, 1, 1], [], []>} : vector<16x144xbf16>, vector<144x128xbf16>, vector<16x128xf32> -> vector<16x128xf32>
    %c1_47 = arith.constant 1 : index
    %c0_48 = arith.constant 0 : index
    %43 = vector.load %arg10[%c1_47, %c0_48] : memref<18x144xbf16, #tpu.memory_space<vmem>>, vector<16x144xbf16>
    %c1_49 = arith.constant 1 : index
    %c0_50 = arith.constant 0 : index
    %c0_51 = arith.constant 0 : index
    %44 = vector.load %arg5[%c1_49, %c0_50, %c0_51] : memref<3x144x128xbf16, #tpu.memory_space<vmem>>, vector<1x144x128xbf16>
    %45 = vector.shape_cast %44 : vector<1x144x128xbf16> to vector<144x128xbf16>
    %cst_52 = arith.constant dense<0.000000e+00> : vector<16x128xf32>
    %46 = tpu.matmul %43, %45, %cst_52 {dimension_numbers = #tpu.dot_dimension_numbers<[1], [0], [0], [1], [0, 0, 1, 1], [], []>} : vector<16x144xbf16>, vector<144x128xbf16>, vector<16x128xf32> -> vector<16x128xf32>
    %47 = arith.addf %42, %46 : vector<16x128xf32>
    %c2_53 = arith.constant 2 : index
    %c0_54 = arith.constant 0 : index
    %48 = vector.load %arg10[%c2_53, %c0_54] : memref<18x144xbf16, #tpu.memory_space<vmem>>, vector<16x144xbf16>
    %c2_55 = arith.constant 2 : index
    %c0_56 = arith.constant 0 : index
    %c0_57 = arith.constant 0 : index
    %49 = vector.load %arg5[%c2_55, %c0_56, %c0_57] : memref<3x144x128xbf16, #tpu.memory_space<vmem>>, vector<1x144x128xbf16>
    %50 = vector.shape_cast %49 : vector<1x144x128xbf16> to vector<144x128xbf16>
    %cst_58 = arith.constant dense<0.000000e+00> : vector<16x128xf32>
    %51 = tpu.matmul %48, %50, %cst_58 {dimension_numbers = #tpu.dot_dimension_numbers<[1], [0], [0], [1], [0, 0, 1, 1], [], []>} : vector<16x144xbf16>, vector<144x128xbf16>, vector<16x128xf32> -> vector<16x128xf32>
    %52 = arith.addf %47, %51 : vector<16x128xf32>
    %c0_59 = arith.constant 0 : index
    %c0_60 = arith.constant 0 : index
    %53 = vector.load %arg6[%c0_59, %c0_60] : memref<1x128xf32, #tpu.memory_space<vmem>>, vector<1x128xf32>
    %54 = vector.broadcast %53 : vector<1x128xf32> to vector<16x128xf32>
    %55 = arith.mulf %52, %54 : vector<16x128xf32>
    %c0_61 = arith.constant 0 : index
    %c0_62 = arith.constant 0 : index
    %56 = vector.load %arg7[%c0_61, %c0_62] : memref<1x128xf32, #tpu.memory_space<vmem>>, vector<1x128xf32>
    %57 = vector.broadcast %56 : vector<1x128xf32> to vector<16x128xf32>
    %58 = arith.addf %55, %57 : vector<16x128xf32>
    %cst_63 = arith.constant 0.000000e+00 : f32
    %59 = vector.broadcast %cst_63 : f32 to vector<16x128xf32>
    %60 = arith.maximumf %58, %59 : vector<16x128xf32>
    %61 = arith.truncf %60 : vector<16x128xf32> to vector<16x128xbf16>
    %c0_64 = arith.constant 0 : index
    %c0_65 = arith.constant 0 : index
    %c0_66 = arith.constant 0 : index
    %62 = vector.load %arg8[%c0_64, %c0_65, %c0_66] : memref<1x16x128xbf16, #tpu.memory_space<vmem>>, vector<1x16x128xbf16>
    %63 = vector.shape_cast %62 : vector<1x16x128xbf16> to vector<16x128xbf16>
    %64 = vector.shape_cast %61 : vector<16x128xbf16> to vector<1x16x128xbf16>
    tpu.vector_store %arg8[%c0_64, %c0_65, %c0_66], %64 {strides = array<i32>} : memref<1x16x128xbf16, #tpu.memory_space<vmem>>, vector<1x16x128xbf16>,
    return
  }
  func.func @transform_0(%arg0: i32) -> (i32, i32, i32) {
    %c0_i32 = arith.constant 0 : i32
    %c0_i32_0 = arith.constant 0 : i32
    %c0_i32_1 = arith.constant 0 : i32
    return %arg0, %c0_i32, %c0_i32_0 : i32, i32, i32
  }
  func.func @transform_1(%arg0: i32) -> (i32, i32, i32) {
    %c0_i32 = arith.constant 0 : i32
    %c0_i32_0 = arith.constant 0 : i32
    %c0_i32_1 = arith.constant 0 : i32
    %c0_i32_2 = arith.constant 0 : i32
    return %c0_i32, %c0_i32_0, %c0_i32_1 : i32, i32, i32
  }
  func.func @transform_2(%arg0: i32) -> (i32, i32) {
    %c0_i32 = arith.constant 0 : i32
    %c0_i32_0 = arith.constant 0 : i32
    %c0_i32_1 = arith.constant 0 : i32
    return %c0_i32, %c0_i32_0 : i32, i32
  }
  func.func @transform_3(%arg0: i32) -> (i32, i32) {
    %c0_i32 = arith.constant 0 : i32
    %c0_i32_0 = arith.constant 0 : i32
    %c0_i32_1 = arith.constant 0 : i32
    return %c0_i32, %c0_i32_0 : i32, i32
  }
  func.func @transform_4(%arg0: i32) -> (i32, i32, i32) {
    %c0_i32 = arith.constant 0 : i32
    %c0_i32_0 = arith.constant 0 : i32
    %c0_i32_1 = arith.constant 0 : i32
    %c0_i32_2 = arith.constant 0 : i32
    return %c0_i32, %c0_i32_0, %c0_i32_1 : i32, i32, i32
  }
  func.func @transform_5(%arg0: i32) -> (i32, i32) {
    %c0_i32 = arith.constant 0 : i32
    %c0_i32_0 = arith.constant 0 : i32
    %c0_i32_1 = arith.constant 0 : i32
    return %c0_i32, %c0_i32_0 : i32, i32
  }
  func.func @transform_6(%arg0: i32) -> (i32, i32) {
    %c0_i32 = arith.constant 0 : i32
    %c0_i32_0 = arith.constant 0 : i32
    %c0_i32_1 = arith.constant 0 : i32
    return %c0_i32, %c0_i32_0 : i32, i32
  }
  func.func @transform_7(%arg0: i32) -> (i32, i32, i32) {
    %c0_i32 = arith.constant 0 : i32
    %c0_i32_0 = arith.constant 0 : i32
    %c0_i32_1 = arith.constant 0 : i32
    return %arg0, %c0_i32, %c0_i32_0 : i32, i32, i32
  }
}

</mosaic_0001>

<bundles_post_ra>
// kernel: double_conv_forward.1
= control target key start
LH: loop header
LB: loop body
LE: loop exit
PB: predicated region body
PF: predicated region fallthrough
CT: control target
= control target key end

     0   :  { %s1554_s24 = smov 0   ;;  %s1852_s0 = inlined_call_operand.vmem [shape: bf16[2,16,64], index: 0, kind: input, shape index: {}]   ;;  %s1853_s1 = inlined_call_operand.vmem [shape: bf16[3,72,128], index: 1, kind: input, shape index: {}]   ;;  %s1854_s2 = inlined_call_operand.vmem [shape: f32[1,128], index: 2, kind: input, shape index: {}]   ;;  %s1855_s3 = inlined_call_operand.vmem [shape: f32[1,128], index: 3, kind: input, shape index: {}]   ;;  %s1856_s4 = inlined_call_operand.vmem [shape: bf16[3,144,128], index: 4, kind: input, shape index: {}]   ;;  %s1857_s5 = inlined_call_operand.vmem [shape: f32[1,128], index: 5, kind: input, shape index: {}]   ;;  %s1858_s6 = inlined_call_operand.vmem [shape: f32[1,128], index: 6, kind: input, shape index: {}]   ;;  %s1859_s7 = inlined_call_operand.vmem [shape: bf16[2,16,128], index: 7, kind: output, shape index: {}]  }
   0x1 LB: > { %s1226_s25 = sadd.s32 4294967295, %s1507_s24   ;;  %p1230_p0 = scmp.ge.s32.totalorder %s1507_s24, 1  ;;  %s1507_s24 = sphi %s1554_s24, %s17_s24  }
   0x2   : > { %p237_p1 = scmp.lt.s32.totalorder %s1507_s24, 3 }
   0x4   : > { %p238_p2 = pnand %p1230_p0, %p237_p1 }
   0x5   : > { %p269_p3 = scmp.lt.s32.totalorder (!%p238_p2), %s1226_s25, 1  ;;  %vm281_vm0 = vsmask.f32 (!%p238_p2), 256  ;;  %vm329_vm1 = vsmask.f32 (!%p238_p2), 4368  ;;  %vm280_vm2 = vcmask (!%p238_p2), 581632  }
   0x6   : > { %241 = sbr.rel (%p238_p2) target bundleno = 793 (0x319), region = 48  ;;  %v1509_v0 = vmov (!%p238_p2), 0.0   ;;  %v1452_v1 = vld [vmem:[%s1853_s1] sm:$0xff] (!%p238_p2)   ;;  %vm282_vm3 = vmand (!%p238_p2), %vm280_vm2, %vm281_vm0  ;;  %v283_v2 = vld [vmem:[#allocation2] sm:$0x1] (!%p238_p2)  ;;  %vm291_vm5 = vcmask (!%p238_p2), 27648  }
   0x7   : > { %1399 = vmatprep.subr.bf16.mxu0 (!%p238_p2), %v1509_v0  ;;  %1385 = vmatprep.subr.bf16.mxu1 (!%p238_p2), %v1509_v0  ;;  %vm286_vm4 = vsmask.f32 (!%p238_p2), 7938  ;;  %v1453_v3 = vld [vmem:[%s1853_s1 + $0x8] sm:$0xff] (!%p238_p2)   ;;  %v284_v4 = vsel (!%p238_p2), %vm282_vm3, 0, %v283_v2  ;;  %vm296_vm6 = vcmask (!%p238_p2), 585248   ;;  %v1510_v7 = vmov (!%p238_p2), 0   ;;  %vm1613_vm10 = vmor (!%p238_p2), %vm281_vm0, %vm329_vm1 }
   0x8   : > { %1400 = vmatpush3.bf16.msra.mxu0 (!%p238_p2), %v1452_v1  ;;  %v1454_v5 = vld [vmem:[%s1853_s1 + $0x24] sm:$0xff] (!%p238_p2)   ;;  %285 = vst [vmem:[#allocation2] sm:$0x1] (!%p238_p2), %v284_v4  ;;  %vm1586_vm7 = vmand (!%p238_p2), %vm280_vm2, %vm286_vm4  ;;  %vm294_vm8 = vcmask (!%p238_p2), 24576   ;;  %v1455_v14 = vld [vmem:[%s1853_s1 + $0x10] sm:$0xff] (!%p238_p2)   ;;  %vm299_vm9 = vcmask (!%p238_p2), 582176  }
   0x9   : > { %1401 = vmatprep.subr.bf16.mxu0 (!%p238_p2), %v1509_v0  ;;  %293 = vst.msk [vmem:[#allocation2 + $0x4] sm:$0xf] (!%p238_p2), %vm291_vm5, %v1510_v7  ;;  %292 = vst.msk [vmem:[#allocation2] sm:$0xf] (!%p238_p2), %vm291_vm5, %v1510_v7  ;;  %1386 = vmatpush3.bf16.msra.mxu1 (!%p238_p2), %v1454_v5  ;;  %v288_v15 = vld [vmem:[#allocation2 + $0x8] sm:$0x1] (!%p238_p2) }
   0xa   : > { %298 = vst.msk [vmem:[#allocation2 + $0x4] sm:$0xf] (!%p238_p2), %vm296_vm6, %v1510_v7  ;;  %297 = vst.msk [vmem:[#allocation2] sm:$0xf] (!%p238_p2), %vm296_vm6, %v1510_v7  ;;  %1387 = vmatprep.subr.bf16.mxu1 (!%p238_p2), %v1509_v0  ;;  %v289_v18 = vsel (!%p238_p2), %vm1586_vm7, 0, %v288_v15  ;;  %v1456_v19 = vld [vmem:[%s1853_s1 + $0x2c] sm:$0xff] (!%p238_p2)  }
   0xb   : > { %290 = vst [vmem:[#allocation2 + $0x8] sm:$0x1] (!%p238_p2), %v289_v18  ;;  %v1457_v20 = vld [vmem:[%s1853_s1 + $0x18] sm:$0xff] (!%p238_p2)   ;;  %v1459_v27 = vld [vmem:[%s1853_s1 + $0x20] ss:$0 sps:$4 sm:$0xff] (!%p238_p2)   ;;  %s1511_s23 = smov (!%p238_p2), 4  }
   0xc   : > { %1402 = vmatpush3.bf16.msra.mxu0 (!%p238_p2), %v1453_v3  ;;  %295 = vst.msk [vmem:[#allocation2 + $0x8] sm:$0x1] (!%p238_p2), %vm294_vm8, %v1510_v7  ;;  %v1458_v26 = vld [vmem:[%s1853_s1 + $0x34] sm:$0xff] (!%p238_p2)   ;;  %vm443_vm11 = vcmask (!%p238_p2), 1043456   ;;  %vm1512_vm12 = vmmov (!%p238_p2), 0   ;;  %v1460_v29 = vld [vmem:[%s1853_s1 + $0x3c] sm:$0xff] (!%p238_p2)  }
   0xd   : > { %s1869_s25 = smov (!%p269_p3, %s1226_s25), 1  ;;  %1403 = vmatprep.subr.bf16.mxu0 %v1509_v0  ;;  %1388 = vmatpush3.bf16.msra.mxu1 %v1456_v19  ;;  %300 = vst.msk [vmem:[#allocation2 + $0x8] sm:$0x1] %vm299_vm9, %v1510_v7  ;;  %v1464_v30 = vld [vmem:[%s1853_s1 + $0x44] ss:$0 sps:$4 sm:$0xff]   ;;  %v518_v31 = vsel %vm443_vm11, %v1459_v27, 0 }
   0xe   : > { %s1356_s28 = sshll.u32 %s1869_s25, 3  ;;  %1389 = vmatprep.subr.bf16.mxu1 %v1509_v0  ;;  %1409 = vmatprep.mubr.msk.bf16.mxu0 %vm1512_vm12, %v1509_v0  ;;  %v445_v32 = vsel %vm443_vm11, %v1464_v30, 0  ;;  %vm357_vm13 = vcmask 551968   ;;  %vm364_vm14 = vcmask 548896   ;;  %vm439_vm2 = vcmask 588800   ;;  %v1463_v43 = vld [vmem:[%s1853_s1 + $0x48] sm:$0xff]  }
   0xf   : > { %s273_s12 = scalar_lea.vmem %s1852_s0, %s1356_s28  ;;  %1395 = vmatprep.mubr.msk.bf16.mxu1 %vm1512_vm12, %v1509_v0  ;;  %vm358_vm15 = vmand %vm357_vm13, %vm286_vm4  ;;  %v1465_v47 = vld [vmem:[%s1853_s1 + $0x50] sm:$0xff]   ;;  %vm399_vm3 = vsmask.f32 7424  ;;  %v1467_v52 = vld [vmem:[%s1853_s1 + $0x58] sm:$0xff]   ;;  %vm575_vm5 = vcmask 1046528   ;;  %vm301_vm6 = vcmask 1040384  }
  0x10   : > { %v327_v8 = vld [vmem:[%s273_s12] sm:$0xf]  ;;  %v328_v9 = vld [vmem:[%s273_s12 + $0x4] sm:$0xf]  ;;  %1404 = vmatpush3.bf16.msra.mxu0 %v1455_v14  ;;  %vm365_vm1 = vmand %vm364_vm14, %vm281_vm0  ;;  %vm303_vm7 = vcmask 126980   ;;  %vm317_vm8 = vcmask 60416  }
  0x11   : > { %v332_v10 = vshrl.u32 %v327_v8, 16  ;;  %v335_v11 = vshll.u32 %v327_v8, 16  ;;  %v340_v12 = vshrl.u32 %v328_v9, 16  ;;  %v343_v13 = vshll.u32 %v328_v9, 16  ;;  %1405 = vmatprep.subr.bf16.mxu0 %v1509_v0  ;;  %1390 = vmatpush3.bf16.msra.mxu1 %v1458_v26  ;;  %v359_v33 = vld [vmem:[#allocation2] sm:$0xf] }
  0x12   : > { %1391 = vmatprep.subr.bf16.mxu1 %v1509_v0  ;;  %v1468_v54 = vld [vmem:[%s1853_s1 + $0x60] sm:$0xff]   ;;  %v1469_v56 = vld [vmem:[%s1853_s1 + $0x68] ss:$0 sps:$4 sm:$0xff]   ;;  %vm304_vm9 = vsmask.f32 4352  ;;  %v1474_v1 = vld [vmem:[%s1856_s4 + $0x50] sm:$0xff]  }
  0x13   : > { %v334_v16 = vrot.slane %v332_v10, 7  ;;  %v342_v17 = vrot.slane %v340_v12, 7  ;;  %v610_v58 = vsel %vm443_vm11, %v1469_v56, 0  ;;  %v1470_v62 = vld [vmem:[%s1856_s4] sm:$0xff]   ;;  %v1472_v63 = vld [vmem:[%s1856_s4 + $0x48] sm:$0xff]   ;;  %vm302_vm11 = vmand %vm301_vm6, %vm281_vm0  ;;  %s1513_s14 = smov 8  }
  0x14   : > { %1406 = vmatpush3.bf16.msra.mxu0 %v1457_v20  ;;  %v366_v34 = vld [vmem:[#allocation2 + $0x8] sm:$0x1]  ;;  %319 = vst.msk [vmem:[#allocation3 + $0x8] sm:$0xf] %vm317_vm8, %v1510_v7  ;;  %v307_v2 = vld [vmem:[#allocation3] sm:$0x11] }
  0x15   : > { %v337_v21 = vor.u32 %v335_v11, %v334_v16  ;;  %v338_v22 = vrot.slane %v334_v16, 4  ;;  %v347_v23 = vrot.slane %v342_v17, 4  ;;  %v345_v24 = vor.u32 %v343_v13, %v342_v17  ;;  %1407 = vmatprep.subr.bf16.mxu0 %v1509_v0  ;;  %1392 = vmatpush3.bf16.msra.mxu1 %v1460_v29  ;;  %v314_v5 = vld [vmem:[#allocation3 + $0x10] sm:$0x11]  ;;  %v1477_v11 = vld [vmem:[%s1856_s4 + $0x20] sm:$0xff]   ;;  %v1479_v27 = vld [vmem:[%s1856_s4 + $0x28] sm:$0xff]  }
  0x16   : > { %1393 = vmatprep.subr.bf16.mxu1 %v1509_v0  ;;  %vm311_vm14 = vsmask.f32 7954  ;;  %v1473_v6 = vld [vmem:[%s1856_s4 + $0x10] sm:$0xff]   ;;  %v1476_v8 = vld [vmem:[%s1856_s4 + $0x58] sm:$0xff]   ;;  %v1274_v17 = vld [vmem:[%s1854_s2] ss:$0 sm:$0xff] }
  0x17   : > { %348 = vrot.lane.b32.xlu0 %v337_v21, %s1511_s23  ;;  %352 = vrot.lane.b32.xlu1 %v347_v23, %s1511_s23  ;;  %v346_v28 = vsel %vm1613_vm10, %v338_v22, %v345_v24  ;;  %v1475_v10 = vld [vmem:[%s1856_s4 + $0x18] sm:$0xff]   ;;  %v1275_v20 = vld [vmem:[%s1855_s3] ss:$0 sm:$0xff] }
  0x18   : > { %1408 = vmatpush3.bf16.msra.mxu0 %v518_v31  ;;  %v1478_v26 = vld [vmem:[%s1856_s4 + $0x60] sm:$0xff]  }
  0x19   : > { %1413 = vmatprep.subr.bf16.mxu0 %v1509_v0  ;;  %1394 = vmatpush3.bf16.msra.mxu1 %v445_v32  ;;  %v1480_v32 = vld [vmem:[%s1856_s4 + $0x68] sm:$0xff]  }
  0x1a   : > { %968 = vmatprep.subr.bf16.mxu1 %v1510_v7 }
  0x1b   : > { %350 = vrot.lane.b32.xlu0 %v346_v28, %s1511_s23  ;;  %s278_s23 = scalar_lea.vmem %s1859_s7, %s1356_s28 }
  0x89   : > { %v349_v35 = vpop.permute.xlu0 %348  ;;  %v353_v36 = vpop.permute.xlu1 %352 }
  0x8a   : > { %v360_v37 = vsel %vm358_vm15, %v349_v35, %v359_v33  ;;  %v367_v38 = vsel %vm365_vm1, %v353_v36, %v366_v34  ;;  %vm1702_vm1 = vmand %vm301_vm6, %vm286_vm4  ;;  %v1481_v33 = vld [vmem:[%s1856_s4 + $0x30] sm:$0xff]  }
  0x8b   : > { %361 = vst [vmem:[#allocation2] sm:$0xf] %v360_v37  ;;  %368 = vst [vmem:[#allocation2 + $0x8] sm:$0x1] %v367_v38  ;;  %v1482_v38 = vld [vmem:[%s1856_s4 + $0x70] sm:$0xff]  }
  0x8d   : > { %v351_v39 = vpop.permute.xlu0 %350 }
  0x8e   : > { %363 = vst.msk [vmem:[#allocation2 + $0x4] sm:$0xf] %vm357_vm13, %v351_v39  ;;  %vm305_vm13 = vmand %vm303_vm7, %vm304_vm9  ;;  %v1483_v39 = vld [vmem:[%s1856_s4 + $0x38] sm:$0xff]  }
  0x8f   : > { %vm306_vm15 = vmor %vm305_vm13, %vm302_vm11  ;;  %vm320_vm11 = vcmask 57344   ;;  %vm325_vm13 = vcmask 122944  }
  0x90   : > { %v308_v3 = vsel %vm306_vm15, 0, %v307_v2  ;;  %vm726_vm15 = vcmask 1040448  }
  0x91   : > { %309 = vst [vmem:[#allocation3] sm:$0x11] %v308_v3 }
  0x92   : > { %v1466_v40 = vld [vmem:[#allocation2 + $0x8] ss:$0 sps:$4 sm:$0x11]   ;;  %v369_v41 = vld [vmem:[#allocation2] sm:$0xf] }
  0x93   : > { %v408_v45 = vshll.u32 %v1466_v40, 16  ;;  %v561_v55 = vld [vmem:[#allocation2] sm:$0xe]  ;;  %v577_v60 = vrot.slane %v1466_v40, 1  ;;  %318 = vst.msk [vmem:[#allocation3] sm:$0xf] %vm317_vm8, %v1510_v7 }
  0x94   : > { %vm716_vm8 = vcmask 64516  }
  0x95   : > { %v370_v42 = vld [vmem:[#allocation2 + $0x4] sm:$0xf]  ;;  %v410_v50 = vrot.slane %v408_v45, 1 }
  0x96   : > { %v1244_v44 = vcombine.low %v369_v41, %v370_v42  ;;  %v1267_v57 = vcombine.low %v561_v55, %v370_v42 }
  0x98   : > { %1410 = vmatmul.mubr.msk.bf16.vlgmr.msra.gmra.mrb[0].mxu0 %vm439_vm2, %v1244_v44  ;;  %v403_v46 = vshll.u32 %v1244_v44, 16  ;;  %v401_v48 = vshrl.u32 %v1244_v44, 16  ;;  %v576_v59 = vrot.slane %v1267_v57, 1  ;;  %v1485_v44 = vld [vmem:[%s1856_s4 + $0x40] sm:$0xff]  }
  0x99   : > { %1414 = vmatpush3.bf16.msra.mxu0 %v1463_v43  ;;  %1423 = vmatprep.mubr.msk.bf16.mxu0 %vm1512_vm12, %v1509_v0  ;;  %vm322_vm12 = vcmask 126016   ;;  %v1484_v43 = vld [vmem:[%s1856_s4 + $0x78] sm:$0xff]  }
  0x9a   : > { %1415 = vmatprep.subr.bf16.mxu0 %v1509_v0  ;;  %v405_v49 = vrot.slane %v403_v46, 1  ;;  %v578_v61 = vsel %vm575_vm5, %v576_v59, %v577_v60  ;;  %324 = vst.msk [vmem:[#allocation3 + $0xc] sm:$0xf] %vm322_vm12, %v1510_v7  ;;  %323 = vst.msk [vmem:[#allocation3 + $0x4] sm:$0xf] %vm322_vm12, %v1510_v7 }
  0x9b   : > { %vm717_vm12 = vmand %vm716_vm8, %vm311_vm14 }
  0x9c   : > { %v406_v51 = vor.u32 %v405_v49, %v401_v48 }
  0x9d   : > { %1416 = vmatpush3.bf16.msra.mxu0 %v1465_v47 }
  0x9e   : > { %v411_v53 = vsel %vm399_vm3, %v406_v51, %v410_v50  ;;  %1417 = vmatprep.subr.bf16.mxu0 %v1509_v0 }
  0x9f   : > { %1396 = vmatmul.mubr.msk.bf16.vlgmr.msra.gmra.mrb[0].mxu1 %vm439_vm2, %v411_v53  ;;  %v1488_v53 = vld [vmem:[%s1856_s4 + $0x88] sm:$0xff]  }
  0xa0   : > { %969 = vmatpush1.bf16.msra.mxu1 %v1470_v62 }
  0xa1   : > { %1418 = vmatpush3.bf16.msra.mxu0 %v1467_v52  ;;  %970 = vmatprep.subr.bf16.mxu1 %v1510_v7  ;;  %v1486_v52 = vld [vmem:[%s1856_s4 + $0x80] sm:$0xff]  }
  0xa2   : > { %1419 = vmatprep.subr.bf16.mxu0 %v1509_v0 }
  0xa5   : > { %1420 = vmatpush3.bf16.msra.mxu0 %v1468_v54  ;;  %v719_v54 = vld [vmem:[#allocation3] sm:$0xff] }
  0xa6   : > { %1421 = vmatprep.subr.bf16.mxu0 %v1509_v0  ;;  %v1471_v0 = vld [vmem:[%s1856_s4 + $0x8] sm:$0xff]  }
  0xa7   : > { %971 = vmatpush1.bf16.msra.mxu1 %v1471_v0 }
  0xa8   : > { %972 = vmatprep.subr.bf16.mxu1 %v1510_v7 }
  0xa9   : > { %1422 = vmatpush3.bf16.msra.mxu0 %v610_v58 }
  0xaa   : > { %870 = vmatprep.subr.bf16.mxu0 %v1510_v7 }
  0xab   : > { %973 = vmatpush1.bf16.msra.mxu1 %v1473_v6 }
  0xac   : > { %1424 = vmatmul.mubr.msk.bf16.vlgmr.msra.gmra.mrb[0].mxu0 %vm439_vm2, %v578_v61  ;;  %vm312_vm2 = vmand %vm303_vm7, %vm311_vm14  ;;  %974 = vmatprep.subr.bf16.mxu1 %v1510_v7  ;;  %vm714_vm7 = vcmask 1043520  }
  0xad   : > { %871 = vmatpush1.bf16.msra.mxu0 %v1472_v63  ;;  %vm313_vm6 = vmor %vm312_vm2, %vm1702_vm1  ;;  %vm728_vm1 = vcmask 61444   ;;  %vm707_vm2 = vcmask 64512  }
  0xae   : > { %872 = vmatprep.subr.bf16.mxu0 %v1510_v7  ;;  %v315_v9 = vsel %vm313_vm6, 0, %v314_v5 }
  0xaf   : > { %316 = vst [vmem:[#allocation3 + $0x10] sm:$0x11] %v315_v9  ;;  %975 = vmatpush1.bf16.msra.mxu1 %v1475_v10 }
  0xb0   : > { %321 = vst.msk [vmem:[#allocation3 + $0x10] sm:$0x1] %vm320_vm11, %v1510_v7  ;;  %976 = vmatprep.subr.bf16.mxu1 %v1510_v7  ;;  %vm1785_vm11 = vmand %vm726_vm15, %vm281_vm0  ;;  %vm866_vm0 = vcmask 130048  }
  0xb1   : > { %873 = vmatpush1.bf16.msra.mxu0 %v1474_v1  ;;  %326 = vst.msk [vmem:[#allocation3 + $0x14] sm:$0x1] %vm325_vm13, %v1510_v7  ;;  %vm729_vm13 = vmand %vm728_vm1, %vm304_vm9 }
  0xb2   : > { %874 = vmatprep.subr.bf16.mxu0 %v1510_v7  ;;  %vm730_vm14 = vmor %vm729_vm13, %vm1785_vm11 }
  0xb3   : > { %977 = vmatpush1.bf16.msra.mxu1 %v1477_v11 }
  0xb4   : > { %978 = vmatprep.subr.bf16.mxu1 %v1510_v7 }
  0xb5   : > { %875 = vmatpush1.bf16.msra.mxu0 %v1476_v8  ;;  %v1487_v8 = vld [vmem:[%s1856_s4 + $0x90] sm:$0xff]  }
  0xb6   : > { %876 = vmatprep.subr.bf16.mxu0 %v1510_v7 }
  0xb7   : > { %979 = vmatpush1.bf16.msra.mxu1 %v1479_v27 }
  0xb8   : > { %980 = vmatprep.subr.bf16.mxu1 %v1510_v7  ;;  %v731_v62 = vld [vmem:[#allocation3 + $0x10] sm:$0x11] }
  0xb9   : > { %877 = vmatpush1.bf16.msra.mxu0 %v1478_v26 }
  0xba   : > { %878 = vmatprep.subr.bf16.mxu0 %v1510_v7 }
  0xbb   : > { %981 = vmatpush1.bf16.msra.mxu1 %v1481_v33  ;;  %v1494_v33 = vld [vmem:[%s1856_s4 + $0xa8] sm:$0xff]  }
  0xbc   : > { %982 = vmatprep.subr.bf16.mxu1 %v1510_v7 }
  0xbd   : > { %879 = vmatpush1.bf16.msra.mxu0 %v1480_v32 }
  0xbe   : > { %880 = vmatprep.subr.bf16.mxu0 %v1510_v7 }
  0xbf   : > { %983 = vmatpush1.bf16.msra.mxu1 %v1483_v39 }
  0xc0   : > { %984 = vmatprep.subr.bf16.mxu1 %v1510_v7 }
  0xc1   : > { %881 = vmatpush1.bf16.msra.mxu0 %v1482_v38  ;;  %v1499_v38 = vld [vmem:[%s1856_s4 + $0xd0] sm:$0xff]  }
  0xc2   : > { %882 = vmatprep.subr.bf16.mxu0 %v1510_v7 }
  0xc3   : > { %985 = vmatpush1.bf16.msra.mxu1 %v1485_v44 }
  0xc4   : > { %1098 = vmatprep.subr.bf16.mxu1 %v1510_v7 }
  0xc5   : > { %883 = vmatpush1.bf16.msra.mxu0 %v1484_v43 }
  0xc6   : > { %884 = vmatprep.subr.bf16.mxu0 %v1510_v7 }
  0xc9   : > { %885 = vmatpush1.bf16.msra.mxu0 %v1486_v52 }
  0xca   : > { %886 = vmatprep.subr.bf16.mxu0 %v1510_v7 }
  0xcd   : > { %887 = vmatpush1.bf16.msra.mxu0 %v1488_v53 }
 0x172   : > { %v481_v12 = vpop.f32.mrb[0].mxu1 }
 0x173   : > { %v1397_v13 = vpop.f32.mrb[1].mxu1 }
 0x174   : > { %v484_v14 = vpop.f32.mrb[2].mxu1 }
 0x175   : > { %v1398_v15 = vpop.f32.mrb[3].mxu1 }
 0x17f   : > { %v646_v16 = vpop.f32.mrb[0].mxu0 }
 0x180   : > { %v1427_v18 = vadd.f32 %v646_v16, %v481_v12  ;;  %v1425_v19 = vpop.f32.mrb[1].mxu0  ;;  %v1489_v16 = vld [vmem:[%s1856_s4 + $0x98] sm:$0xff]  }
 0x181   : > { %v649_v21 = vpop.f32.mrb[2].mxu0 }
 0x182   : > { %v662_v22 = vmul.f32 %v1427_v18, %v1274_v17  ;;  %v1428_v23 = vadd.f32 %v649_v21, %v484_v14  ;;  %v1426_v24 = vpop.f32.mrb[3].mxu0 }
 0x184   : > { %v671_v28 = vadd.f32 %v1275_v20, %v662_v22  ;;  %v663_v29 = vmul.f32 %v1428_v23, %v1274_v17 }
 0x186   : > { %v673_v30 = vmax.f32 %v671_v28, 0.0  ;;  %v672_v31 = vadd.f32 %v1275_v20, %v663_v29 }
 0x188   : > { %v1358_v34 = vpack.c.bf16 %v673_v30, %v673_v30  ;;  %v674_v35 = vmax.f32 %v672_v31, 0.0  ;;  %v1493_v31 = vld [vmem:[%s1856_s4 + $0xa0] sm:$0xff]  }
 0x18a   : > { %v1359_v36 = vpack.c.bf16 %v674_v35, %v674_v35  ;;  %v682_v37 = vshrl.u32 %v1358_v34, 16  ;;  %v685_v42 = vshll.u32 %v1358_v34, 16  ;;  %v1495_v34 = vld [vmem:[%s1856_s4 + $0xb0] sm:$0xff]   ;;  %v1496_v35 = vld [vmem:[%s1856_s4 + $0xb8] sm:$0xff]  }
 0x18c   : > { %v690_v40 = vshrl.u32 %v1359_v36, 16  ;;  %v684_v41 = vrot.slane %v682_v37, 7  ;;  %v693_v46 = vshll.u32 %v1359_v36, 16  ;;  %v1497_v36 = vld [vmem:[%s1856_s4 + $0xc0] sm:$0xff]   ;;  %v1498_v37 = vld [vmem:[%s1856_s4 + $0xc8] sm:$0xff]  }
 0x18e   : > { %v692_v45 = vrot.slane %v690_v40, 7  ;;  %v687_v47 = vor.u32 %v685_v42, %v684_v41  ;;  %v688_v48 = vrot.slane %v684_v41, 4 }
 0x190   : > { %698 = vrot.lane.b32.xlu1 %v687_v47, %s1513_s14  ;;  %v695_v49 = vor.u32 %v693_v46, %v692_v45  ;;  %v697_v51 = vrot.slane %v692_v45, 4 }
 0x192   : > { %v696_v50 = vsel %vm1613_vm10, %v688_v48, %v695_v49  ;;  %vm715_vm10 = vmand %vm714_vm7, %vm286_vm4  ;;  %v1350_v48 = vld [vmem:[%s1857_s5] ss:$0 sm:$0xff] }
 0x193   : > { %700 = vrot.lane.b32.xlu0 %v696_v50, %s1513_s14  ;;  %vm718_vm6 = vmor %vm717_vm12, %vm715_vm10 }
 0x194   : > { %702 = vrot.lane.b32.xlu1 %v697_v51, %s1513_s14  ;;  %vm724_vm4 = vmor %vm716_vm8, %vm714_vm7 }
 0x202   : > { %v699_v25 = vpop.permute.xlu1 %698 }
 0x203   : > { %v704_v55 = vrot.slane %v699_v25, 4 }
 0x205   : > { %v708_v57 = vsel %vm707_vm2, %v704_v55, %v699_v25  ;;  %v701_v58 = vpop.permute.xlu0 %700 }
 0x206   : > { %v720_v59 = vsel %vm718_vm6, %v708_v57, %v719_v54  ;;  %v705_v60 = vrot.slane %v701_v58, 4  ;;  %v703_v61 = vpop.permute.xlu1 %702 }
 0x207   : > { %721 = vst [vmem:[#allocation3] sm:$0xff] %v720_v59  ;;  %v706_v63 = vrot.slane %v703_v61, 4 }
 0x208   : > { %v709_v0 = vsel %vm707_vm2, %v705_v60, %v701_v58 }
 0x209   : > { %725 = vst.msk [vmem:[#allocation3 + $0x8] sm:$0xff] %vm724_vm4, %v709_v0  ;;  %v710_v1 = vsel %vm707_vm2, %v706_v63, %v703_v61 }
 0x20a   : > { %v732_v2 = vsel %vm730_vm14, %v710_v1, %v731_v62 }
 0x20b   : > { %733 = vst [vmem:[#allocation3 + $0x10] sm:$0x11] %v732_v2 }
 0x20e   : > { %v1009_v4 = vld [vmem:[#allocation3] sm:$0xee] }
 0x210   : > { %v735_v3 = vld [vmem:[#allocation3 + $0x8] sm:$0xff] }
 0x211   : > { %v1297_v5 = vcombine.high %v720_v59, %v735_v3  ;;  %v1296_v6 = vcombine.low %v720_v59, %v735_v3  ;;  %v1339_v9 = vcombine.high %v1009_v4, %v735_v3  ;;  %v1338_v39 = vcombine.low %v1009_v4, %v735_v3 }
 0x212   : > { %v754_v10 = vld [vmem:[#allocation3 + $0x10] sm:$0x11] }
 0x213   : > { %1319 = vmatprep.mubr.msk.bf16.mxu1 %vm866_vm0, %v1297_v5  ;;  %v1299_v11 = vcombine.high %v754_v10, %v754_v10  ;;  %v802_v12 = vshll.u32 %v1297_v5, 16  ;;  %v1037_v13 = vrot.slane %v1339_v9, 1  ;;  %v1298_v14 = vcombine.low %v754_v10, %v754_v10 }
 0x214   : > { %1001 = vmatmul.mubr.bf16.vlgmr.msra.gmra.mrb[4].mxu1 %v1296_v6  ;;  %v790_v15 = vshll.u32 %v1296_v6, 16  ;;  %v800_v18 = vshrl.u32 %v1297_v5, 16  ;;  %v788_v21 = vshrl.u32 %v1296_v6, 16  ;;  %v1034_v41 = vrot.slane %v1338_v39, 1 }
 0x215   : > { %1099 = vmatpush1.bf16.msra.mxu1 %v1487_v8  ;;  %v1038_v17 = vrot.slane %v1299_v11, 1  ;;  %v804_v19 = vrot.slane %v802_v12, 1  ;;  %v807_v20 = vshll.u32 %v1299_v11, 16  ;;  %v795_v23 = vshll.u32 %v1298_v14, 16 }
 0x216   : > { %1100 = vmatprep.subr.bf16.mxu1 %v1510_v7  ;;  %v792_v22 = vrot.slane %v790_v15, 1  ;;  %v1035_v40 = vrot.slane %v1298_v14, 1 }
 0x217   : > { %v1039_v24 = vsel %vm575_vm5, %v1037_v13, %v1038_v17  ;;  %v805_v26 = vor.u32 %v804_v19, %v800_v18  ;;  %v809_v27 = vrot.slane %v807_v20, 1  ;;  %v797_v29 = vrot.slane %v795_v23, 1 }
 0x218   : > { %1349 = vmatprep.mubr.msk.bf16.mxu1 %vm866_vm0, %v1039_v24  ;;  %v793_v28 = vor.u32 %v792_v22, %v788_v21  ;;  %v1036_v42 = vsel %vm575_vm5, %v1034_v41, %v1035_v40 }
 0x219   : > { %1101 = vmatpush1.bf16.msra.mxu1 %v1489_v16  ;;  %v810_v30 = vsel %vm399_vm3, %v805_v26, %v809_v27 }
 0x21a   : > { %1309 = vmatprep.mubr.msk.bf16.mxu0 %vm866_vm0, %v810_v30  ;;  %v798_v32 = vsel %vm399_vm3, %v793_v28, %v797_v29  ;;  %1102 = vmatprep.subr.bf16.mxu1 %v1510_v7 }
 0x21b   : > { %903 = vmatmul.mubr.bf16.vlgmr.msra.gmra.mrb[4].mxu0 %v798_v32 }
 0x21d   : > { %1103 = vmatpush1.bf16.msra.mxu1 %v1493_v31 }
 0x21e   : > { %1104 = vmatprep.subr.bf16.mxu1 %v1510_v7 }
 0x221   : > { %1105 = vmatpush1.bf16.msra.mxu1 %v1494_v33 }
 0x222   : > { %1106 = vmatprep.subr.bf16.mxu1 %v1510_v7 }
 0x225   : > { %1107 = vmatpush1.bf16.msra.mxu1 %v1495_v34 }
 0x226   : > { %1108 = vmatprep.subr.bf16.mxu1 %v1510_v7 }
 0x229   : > { %1109 = vmatpush1.bf16.msra.mxu1 %v1496_v35 }
 0x22a   : > { %1110 = vmatprep.subr.bf16.mxu1 %v1510_v7 }
 0x22d   : > { %1111 = vmatpush1.bf16.msra.mxu1 %v1497_v36 }
 0x22e   : > { %1112 = vmatprep.subr.bf16.mxu1 %v1510_v7 }
 0x231   : > { %1113 = vmatpush1.bf16.msra.mxu1 %v1498_v37 }
 0x232   : > { %1114 = vmatprep.subr.bf16.mxu1 %v1510_v7  ;;  %v1351_v7 = vld [vmem:[%s1858_s6] ss:$0 sm:$0xff] }
 0x235   : > { %1115 = vmatpush1.bf16.msra.mxu1 %v1499_v38 }
 0x238   : > { %1131 = vmatmul.mubr.bf16.vlgmr.msra.gmra.mrb[4].mxu1 %v1036_v42 }
 0x2ee   : > { %v904_v43 = vpop.f32.mrb[4].mxu0 }
 0x2ef   : > { %v906_v44 = vpop.f32.mrb[5].mxu0 }
 0x2f0   : > { %v907_v45 = vpop.f32.mrb[6].mxu0 }
 0x2f1   : > { %v909_v46 = vpop.f32.mrb[7].mxu0 }
 0x30b   : > { %v1132_v47 = vpop.f32.mrb[4].mxu1 }
 0x30c   : > { %v1429_v49 = vadd.f32 %v1132_v47, %v904_v43  ;;  %v1134_v50 = vpop.f32.mrb[5].mxu1 }
 0x30d   : > { %v1135_v51 = vpop.f32.mrb[6].mxu1 }
 0x30e   : > { %v1148_v52 = vmul.f32 %v1429_v49, %v1350_v48  ;;  %v1430_v53 = vadd.f32 %v1135_v51, %v907_v45  ;;  %v1137_v25 = vpop.f32.mrb[7].mxu1 }
 0x310   : > { %v1157_v54 = vadd.f32 %v1351_v7, %v1148_v52  ;;  %v1149_v55 = vmul.f32 %v1430_v53, %v1350_v48 }
 0x312   : > { %v1158_v56 = vadd.f32 %v1351_v7, %v1149_v55  ;;  %v1159_v57 = vmax.f32 %v1157_v54, 0.0 }
 0x314   : > { %v1160_v58 = vmax.f32 %v1158_v56, 0.0 }
 0x316   : > { %v1365_v59 = vpack.c.bf16 %v1160_v58, %v1159_v57 }
 0x318   : > { %1366 = vst [vmem:[%s278_s23] sm:$0xff] %v1365_v59  }
 0x319 PF: > { %s17_s24 = sadd.s32 1, %s1507_s24  }
 0x31a   : > { %p14_p4 = scmp.ge.s32.totalorder %s17_s24, 4  }
 0x31c   :  { %16 = sbr.rel (!%p14_p4) target bundleno = 1 (0x1), region = 82 }

</bundles_post_ra>
